<compile_context>
chip_gen: v5e
topology: v5e:2x2
jax: 0.10.0
libtpu: 0.0.40
codegen_flags: <defaults>
</compile_context>

<pallas_src>
import jax
import jax.numpy as jnp
from jax.experimental import pallas as pl
from jax.experimental.pallas import tpu as pltpu


# ---------------------------------------------------------------------------
# Kernels
# ---------------------------------------------------------------------------

def _proj_kernel(x_ref, w_ref, b_ref, p_ref):
    """Hoisted input projection for one (direction, row-chunk) grid point.

    x_ref: (Rc, I)  rows of the flattened (T*B, I) input
    w_ref: (I, H)   W_ih for this direction (pre-transposed)
    b_ref: (1, H)   combined bias b_ih + b_hh for this direction
    p_ref: (Rc, H)  f32 projection output
    """
    p_ref[...] = (
        jnp.dot(x_ref[...], w_ref[...], preferred_element_type=jnp.float32)
        + b_ref[...]
    )


def _birnn_kernel(p_ref, w_hh_ref, out_ref, h_ref):
    """Fused bidirectional recurrence; one grid point = (direction, time chunk).

    p_ref:    (Tc, B, H) precomputed x-projection (+bias), f32
    w_hh_ref: (H, H)     hidden->hidden weight for this direction
    out_ref:  (Tc, B, H) hidden outputs for this chunk
    h_ref:    (B, H)     f32 recurrent state, persists across time chunks
    """
    c = pl.program_id(1)
    is_rev = pl.program_id(0) == 1
    tc = out_ref.shape[0]

    @pl.when(c == 0)
    def _():
        # state is None in the reference forward -> zeros(B, H)
        h_ref[...] = jnp.zeros_like(h_ref)

    w_hh = w_hh_ref[...]

    def step(s, h):
        # forward walks local steps 0..Tc-1, reverse walks Tc-1..0
        j = jnp.where(is_rev, tc - 1 - s, s)
        pre = (
            jnp.dot(h.astype(w_hh.dtype), w_hh, preferred_element_type=jnp.float32)
            + p_ref[j]
        )
        h_new = jnp.tanh(pre)          # f32 tanh (v5e-safe)
        out_ref[j] = h_new.astype(out_ref.dtype)
        return h_new

    h_ref[...] = jax.lax.fori_loop(0, tc, step, h_ref[...], unroll=True)


# ---------------------------------------------------------------------------
# Wrapper
# ---------------------------------------------------------------------------

def _pick_chunk(n, max_chunk, align=1):
    """Largest divisor of n that is <= max_chunk and is a multiple of `align`
    (or the full extent n, which is always a legal block)."""
    best = None
    for c in range(1, min(n, max_chunk) + 1):
        if n % c == 0 and (c % align == 0 or c == n):
            best = c
    return best if best is not None else n


def bicus_rnn_layer(x, params, *, compute_dtype=None, time_chunk=64):
    """BiCusRNNLayer.forward for a full (non-ragged) packed sequence.

    x: (T, B, I) time-major input (packed data with constant batch_sizes == B).
    Returns (T, B, 2H): concat of forward and reverse RNN outputs (the data
    field of the returned PackedSequence).
    """
    T, B, I = x.shape
    H = params["w_hh"].shape[-1]
    cd = compute_dtype if compute_dtype is not None else x.dtype

    w_ih = params["w_ih"].astype(cd)          # (2, I, H)
    w_hh = params["w_hh"].astype(cd)          # (2, H, H)
    b = params["b"].astype(jnp.float32)       # (2, 1, H) combined bias
    x2 = x.reshape(T * B, I).astype(cd)       # flattened time*batch rows

    # ---- 1) hoisted input projection: big matmuls, both directions --------
    rc = _pick_chunk(T * B, 512, align=8)
    n_rows = (T * B) // rc
    p2 = pl.pallas_call(
        _proj_kernel,
        out_shape=jax.ShapeDtypeStruct((2, T * B, H), jnp.float32),
        grid_spec=pltpu.PrefetchScalarGridSpec(
            num_scalar_prefetch=0,
            grid=(2, n_rows),
            in_specs=[
                pl.BlockSpec((rc, I), lambda d, r: (r, 0)),
                pl.BlockSpec((None, I, H), lambda d, r: (d, 0, 0)),
                pl.BlockSpec((None, 1, H), lambda d, r: (d, 0, 0)),
            ],
            out_specs=pl.BlockSpec((None, rc, H), lambda d, r: (d, r, 0)),
        ),
        compiler_params=pltpu.CompilerParams(
            dimension_semantics=("parallel", "parallel"),
        ),
    )(x2, w_ih, b)
    p = p2.reshape(2, T, B, H)                # free reshape (contiguous split)

    # ---- 2) fused bidirectional recurrence, chunked over time -------------
    tc = _pick_chunk(T, time_chunk, align=1)
    n_chunks = T // tc

    def time_block(d, c):
        # forward direction walks chunks 0..n-1; reverse walks n-1..0
        return (1 - d) * c + d * (n_chunks - 1 - c)

    out = pl.pallas_call(
        _birnn_kernel,
        out_shape=jax.ShapeDtypeStruct((2, T, B, H), x.dtype),
        grid_spec=pltpu.PrefetchScalarGridSpec(
            num_scalar_prefetch=0,
            grid=(2, n_chunks),
            in_specs=[
                pl.BlockSpec((None, tc, B, H),
                             lambda d, c: (d, time_block(d, c), 0, 0)),
                pl.BlockSpec((None, H, H), lambda d, c: (d, 0, 0)),
            ],
            out_specs=pl.BlockSpec((None, tc, B, H),
                                   lambda d, c: (d, time_block(d, c), 0, 0)),
            scratch_shapes=[pltpu.VMEM((B, H), jnp.float32)],
        ),
        compiler_params=pltpu.CompilerParams(
            # directions are independent -> parallel (2 TCs on v7x);
            # time chunks carry the recurrent state -> arbitrary (sequential)
            dimension_semantics=("parallel", "arbitrary"),
        ),
    )(p, w_hh)

    # Glue: torch.cat((outputs, routputs), -1)
    return jnp.concatenate([out[0], out[1]], axis=-1)


# ---------------------------------------------------------------------------
# Params / reference
# ---------------------------------------------------------------------------

def _init_params(key, input_size, hidden_size, dtype=jnp.float32):
    """nn.RNNCell-style shapes: W_ih (H,I), W_hh (H,H), b_ih, b_hh per
    direction; uniform(-1/sqrt(H), 1/sqrt(H)).  Stored stacked & transposed."""
    bound = 1.0 / (hidden_size ** 0.5)
    keys = jax.random.split(key, 8)

    def u(k, shape):
        return jax.random.uniform(k, shape, dtype, minval=-bound, maxval=bound)

    w_ih = jnp.stack([u(keys[0], (hidden_size, input_size)),
                      u(keys[4], (hidden_size, input_size))])      # (2, H, I)
    w_hh = jnp.stack([u(keys[1], (hidden_size, hidden_size)),
                      u(keys[5], (hidden_size, hidden_size))])     # (2, H, H)
    b_ih = jnp.stack([u(keys[2], (hidden_size,)), u(keys[6], (hidden_size,))])
    b_hh = jnp.stack([u(keys[3], (hidden_size,)), u(keys[7], (hidden_size,))])

    return {
        "w_ih": jnp.transpose(w_ih, (0, 2, 1)),   # (2, I, H) for x @ W
        "w_hh": jnp.transpose(w_hh, (0, 2, 1)),   # (2, H, H) for h @ W
        "b": (b_ih + b_hh)[:, None, :],           # (2, 1, H) combined bias
    }


def _reference(x, params, compute_dtype=None):
    """Pure-JAX reference of the same bidirectional tanh RNN (same casts)."""
    T, B, _ = x.shape
    cd = compute_dtype if compute_dtype is not None else x.dtype
    w_ih = params["w_ih"].astype(cd)
    w_hh = params["w_hh"].astype(cd)
    b = params["b"].astype(jnp.float32)

    def run(xs, wi, wh, bb):
        def step(h, xt):
            pre = (jnp.dot(xt.astype(cd), wi, preferred_element_type=jnp.float32)
                   + jnp.dot(h.astype(cd), wh, preferred_element_type=jnp.float32)
                   + bb)
            h_new = jnp.tanh(pre)
            return h_new, h_new
        h0 = jnp.zeros((B, w_hh.shape[-1]), jnp.float32)
        _, ys = jax.lax.scan(step, h0, xs)
        return ys

    fwd = run(x, w_ih[0], w_hh[0], b[0])
    rev = run(x[::-1], w_ih[1], w_hh[1], b[1])[::-1]
    return jnp.concatenate([fwd, rev], axis=-1).astype(x.dtype)


if __name__ == "__main__":
    T, B, I, H = 8, 4, 16, 32  # seq=8, batch=4, input=16, hidden=32

    key = jax.random.PRNGKey(0)
    k_x, k_p = jax.random.split(key)
    x = jax.random.normal(k_x, (T, B, I), jnp.float32)
    params = _init_params(k_p, I, H)

    # f32 path (strict accuracy; v5e-friendly)
    out_f32 = jax.block_until_ready(
        bicus_rnn_layer(x, params, compute_dtype=jnp.float32))
    assert out_f32.shape == (T, B, 2 * H), out_f32.shape
    ref_f32 = _reference(x, params, compute_dtype=jnp.float32)
    err = float(jnp.max(jnp.abs(out_f32 - ref_f32)))
    assert err < 1e-4, err

    # bf16 MXU-operand path (v6e/v7x perf guidance), f32 accumulation/state
    out_bf16 = jax.block_until_ready(
        bicus_rnn_layer(x, params, compute_dtype=jnp.bfloat16))
    ref_bf16 = _reference(x, params, compute_dtype=jnp.bfloat16)
    err_bf = float(jnp.max(jnp.abs(out_bf16 - ref_bf16)))
    assert err_bf < 5e-2, err_bf

    print("KERNEL_OK")
</pallas_src>

<mosaic_0001>
module attributes {stable_mosaic.version = 11 : i64} {
  func.func @_proj_kernel(%arg0: i32, %arg1: i32, %arg2: memref<32x16xf32, #tpu.memory_space<vmem>>, %arg3: memref<1x16x32xf32, #tpu.memory_space<vmem>>, %arg4: memref<1x1x32xf32, #tpu.memory_space<vmem>>, %arg5: memref<1x32x32xf32, #tpu.memory_space<vmem>>) attributes {dimension_semantics = [#tpu.dimension_semantics<parallel>, #tpu.dimension_semantics<parallel>], iteration_bounds = array<i64: 2, 1>, scalar_prefetch = 0 : i64, scratch_operands = 0 : i64, tpu.core_type = #tpu.core_type<tc>, window_params = [{transform_indices = @transform_0, window_bounds = array<i64: 32, 16>}, {transform_indices = @transform_1, window_bounds = array<i64: 1, 16, 32>}, {transform_indices = @transform_2, window_bounds = array<i64: 1, 1, 32>}, {transform_indices = @transform_3, window_bounds = array<i64: 1, 32, 32>}]} {
    %c0 = arith.constant 0 : index
    %c0_0 = arith.constant 0 : index
    %0 = vector.load %arg2[%c0, %c0_0] : memref<32x16xf32, #tpu.memory_space<vmem>>, vector<32x16xf32>
    %c0_1 = arith.constant 0 : index
    %c0_2 = arith.constant 0 : index
    %c0_3 = arith.constant 0 : index
    %1 = vector.load %arg3[%c0_1, %c0_2, %c0_3] : memref<1x16x32xf32, #tpu.memory_space<vmem>>, vector<1x16x32xf32>
    %2 = vector.shape_cast %1 : vector<1x16x32xf32> to vector<16x32xf32>
    %cst = arith.constant dense<0.000000e+00> : vector<32x32xf32>
    %3 = tpu.matmul %0, %2, %cst {dimension_numbers = #tpu.dot_dimension_numbers<[1], [0], [0], [1], [0, 0, 1, 1], [], []>} : vector<32x16xf32>, vector<16x32xf32>, vector<32x32xf32> -> vector<32x32xf32>
    %c0_4 = arith.constant 0 : index
    %c0_5 = arith.constant 0 : index
    %c0_6 = arith.constant 0 : index
    %4 = vector.load %arg4[%c0_4, %c0_5, %c0_6] : memref<1x1x32xf32, #tpu.memory_space<vmem>>, vector<1x1x32xf32>
    %5 = vector.shape_cast %4 : vector<1x1x32xf32> to vector<1x32xf32>
    %6 = vector.broadcast %5 : vector<1x32xf32> to vector<32x32xf32>
    %7 = arith.addf %3, %6 : vector<32x32xf32>
    %c0_7 = arith.constant 0 : index
    %c0_8 = arith.constant 0 : index
    %c0_9 = arith.constant 0 : index
    %8 = vector.load %arg5[%c0_7, %c0_8, %c0_9] : memref<1x32x32xf32, #tpu.memory_space<vmem>>, vector<1x32x32xf32>
    %9 = vector.shape_cast %8 : vector<1x32x32xf32> to vector<32x32xf32>
    %10 = vector.shape_cast %7 : vector<32x32xf32> to vector<1x32x32xf32>
    tpu.vector_store %arg5[%c0_7, %c0_8, %c0_9], %10 {strides = array<i32>} : memref<1x32x32xf32, #tpu.memory_space<vmem>>, vector<1x32x32xf32>,
    return
  }
  func.func @transform_0(%arg0: i32, %arg1: i32) -> (i32, i32) {
    %c0_i32 = arith.constant 0 : i32
    %c0_i32_0 = arith.constant 0 : i32
    return %arg1, %c0_i32 : i32, i32
  }
  func.func @transform_1(%arg0: i32, %arg1: i32) -> (i32, i32, i32) {
    %c0_i32 = arith.constant 0 : i32
    %c0_i32_0 = arith.constant 0 : i32
    %c0_i32_1 = arith.constant 0 : i32
    return %arg0, %c0_i32, %c0_i32_0 : i32, i32, i32
  }
  func.func @transform_2(%arg0: i32, %arg1: i32) -> (i32, i32, i32) {
    %c0_i32 = arith.constant 0 : i32
    %c0_i32_0 = arith.constant 0 : i32
    %c0_i32_1 = arith.constant 0 : i32
    return %arg0, %c0_i32, %c0_i32_0 : i32, i32, i32
  }
  func.func @transform_3(%arg0: i32, %arg1: i32) -> (i32, i32, i32) {
    %c0_i32 = arith.constant 0 : i32
    %c0_i32_0 = arith.constant 0 : i32
    return %arg0, %arg1, %c0_i32 : i32, i32, i32
  }
}

</mosaic_0001>

<bundles_post_ra>
// kernel: tpu_custom_call.1
= control target key start
LH: loop header
LB: loop body
LE: loop exit
PB: predicated region body
PF: predicated region fallthrough
CT: control target
= control target key end

     0   :  { %8 = vsyncpa [#allocation3], 0  ;;  %s694_s0 = inlined_call_operand.vmem [shape: f32[32,16], index: 0, kind: input, shape index: {}]   ;;  %s695_s1 = inlined_call_operand.vmem [shape: f32[2,16,32], index: 1, kind: input, shape index: {}]   ;;  %s696_s2 = inlined_call_operand.vmem [shape: f32[2,1,32], index: 2, kind: input, shape index: {}]   ;;  %s697_s3 = inlined_call_operand.hbm [shape: f32[2,32,32], index: 3, kind: output, shape index: {}]  }
   0x1   :  { %10 = vsyncpa [#allocation3 + $0x1], 0  ;;  %s578_s12 = smov 0   ;;  %s580_s13 = smov 0  }
   0x2   :  { %s582_s14 = smov 0   ;;  %s584_s15 = smov 0  }
   0x3   :  { %s586_s16 = smov 0   ;;  %s588_s17 = smov 0  }
   0x4 LB: > { %s392_s18 = sadd.s32 4294967295, %s554_s17   ;;  %s393_s19 = sadd.s32 4294967294, %s554_s17   ;;  %s554_s17 = sphi %s588_s17, %s16_s17   ;;  %s550_s16 = sphi %s586_s16, %s704_s16   ;;  %s546_s15 = sphi %s584_s15, %s703_s15   ;;  %s542_s14 = sphi %s582_s14, %s702_s14   ;;  %s538_s13 = sphi %s580_s13, %s701_s13   ;;  %s534_s12 = sphi %s578_s12, %s700_s12  }
   0x5   : > { %s28_s20 = sadd.s32 1, %s550_s16  ;;  %s115_s21 = sadd.s32 1, %s542_s14 }
   0x6   : > { %p30_p0 = scmp.ge.s32.totalorder %s28_s20, 2  ;;  %p125_p1 = scmp.ne.s32.totalorder %s542_s14, %s538_s13 }
   0x7   : > { %p126_p2 = scmp.eq.s32.totalorder %s392_s18, 1  ;;  %p131_p3 = scmp.ne.s32.totalorder %s538_s13, %s534_s12 }
   0x8   : > { %s706_s20 = smov (%p30_p0, %s28_s20), 0  ;;  %p132_p5 = scmp.eq.s32.totalorder %s393_s19, 1 }
   0x9   : > { %p618_p4 = por %p126_p2, %p125_p1  ;;  %s110_s23 = ssub.s32 %s550_s16, %s706_s20 }
   0xa   : > { %p397_p6 = scmp.ge.s32.totalorder %s554_s17, 1  ;;  %p113_p7 = scmp.eq.s32.totalorder %s110_s23, 0 }
   0xb   : > { %p625_p8 = por %p132_p5, %p131_p3  ;;  %p173_p9 = scmp.lt.s32.totalorder %s554_s17, 3 }
   0xc   : > { %s631_s25 = scalar_select %p113_p7, %s542_s14, %s115_s21  }
   0xd   : > { %p174_p10 = pnand %p397_p6, %p173_p9 }
   0xe   : > { %p211_p11 = scmp.lt.s32.totalorder (!%p174_p10), %s546_s15, 1  ;;  %s202_s23 = sand.u32 (!%p174_p10), 1, %s538_s13  }
   0xf   : > { %177 = sbr.rel (%p174_p10) target bundleno = 167 (0xa7), region = 32  ;;  %s496_s11 = scalar_lea.hbm (!%p174_p10), %s697_s3, 64 }
  0x14   : > { %s212_s26 = scalar_select %p211_p11, %s546_s15, 1  ;;  %v222_v2 = vld [vmem:[%s694_s0 + $0x10] sm:$0xff]  ;;  %vm230_vm0 = vcmask 130048   ;;  %v223_v3 = vld [vmem:[%s694_s0 + $0x18] sm:$0xff]  ;;  %v220_v4 = vld [vmem:[%s694_s0] sm:$0xff]  ;;  %vm272_vm1 = vcmask 261120  }
  0x15   : > { %v221_v5 = vld [vmem:[%s694_s0 + $0x8] sm:$0xff] }
  0x16   : > { %s410_s27 = sshll.u32 %s212_s26, 4  ;;  %s218_s30 = scalar_lea.vmem %s696_s2, %s212_s26 }
  0x17   : > { %s215_s6 = scalar_lea.vmem %s695_s1, %s410_s27  ;;  %s398_s26 = sshll.u32 %s202_s23, 5  ;;  %v475_v6 = vld [vmem:[%s218_s30] ss:$0 sm:$0xff] }
  0x18   : > { %v225_v0 = vld [vmem:[%s215_s6 + $0x8] sm:$0xff]  ;;  %v224_v1 = vld [vmem:[%s215_s6] sm:$0xff]  ;;  %s411_s27 = sshll.u32 %s546_s15, 5  ;;  %s204_s5 = scalar_lea.vmem [#allocation2], %s398_s26 }
  0x19   : > { %413 = vmatpush.msra.mxu2 %v225_v0  ;;  %414 = vmatpush.msra.mxu3 %v225_v0  ;;  %s291_s4 = scalar_lea.hbm %s697_s3, %s411_s27  ;;  %s292_s6 = sshll.u32 %s204_s5, 4  ;;  %s293_s6 = int_to_ptr.vmem [resolvable:$true] %s292_s6 }
  0x1a   : > { %257 = vmatpush.msra.mxu0 %v225_v0  ;;  %412 = vmatpush.msra.mxu1 %v225_v0  ;;  %s294_s7 = sshll.u32 %s291_s4, 4  ;;  %s278_s15 = scalar_lea.sflag [#allocation3], %s202_s23  ;;  %s295_s7 = int_to_ptr.hbm [resolvable:$true] %s294_s7 }
  0x1b   : > { %416 = vmatpush.msra.mxu2 %v224_v1  ;;  %417 = vmatpush.msra.mxu3 %v224_v1  ;;  %s490_s30 = sshra.s32 %s295_s7, 4  ;;  %s491_s30 = int_to_ptr.hbm [resolvable:$true] %s490_s30 }
  0x1c   : > { %403 = vmatmul.msk.f32.vlgmr.msra.gmra.mxu2 %vm230_vm0, %v222_v2  ;;  %404 = vmatmul.msk.f32.vlgmr.msra.gmra.mxu3 %vm230_vm0, %v223_v3  ;;  %s492_s8 = scalar_lea.hbm %s491_s30, 32  ;;  %p497_p1 = scmp.lt.s32.totalorder %s491_s30, %s697_s3 }
  0x1d   : > { %258 = vmatpush.msra.mxu0 %v224_v1  ;;  %415 = vmatpush.msra.mxu1 %v224_v1  ;;  %p493_p12 = scmp.ne.s32.totalorder %s491_s30, %s492_s8  ;;  %p498_p2 = scmp.lt.s32.totalorder %s496_s11, %s492_s8 }
  0x1e   : > { %401 = vmatmul.msk.f32.vlgmr.msra.gmra.mxu0 %vm230_vm0, %v220_v4  ;;  %402 = vmatmul.msk.f32.vlgmr.msra.gmra.mxu1 %vm230_vm0, %v221_v5 }
  0x1f   : > { %p494_p13 = pnand %p493_p12, %p618_p4  ;;  %p499_p3 = por %p498_p2, %p497_p1 }
  0x21   : > { %p495_p0 = pneg %p494_p13 }
  0x23   : > { %p500_p5 = pnand %p499_p3, %p495_p0 }
  0x9b   : > { %v260_v7 = vpop.f32.mrf.mxu0  ;;  %v263_v8 = vpop.f32.mrf.mxu1 }
  0x9c   : > { %v261_v9 = vadd.f32 %v475_v6, %v260_v7  ;;  %v264_v10 = vadd.f32 %v475_v6, %v263_v8 }
  0x9e   : > { %273 = vst.msk [vmem:[%s204_s5] sm:$0xff] %vm272_vm1, %v261_v9 }
  0x9f   : > { %274 = vst.msk [vmem:[%s204_s5 + $0x8] sm:$0xff] %vm272_vm1, %v264_v10  ;;  %v266_v11 = vpop.f32.mrf.mxu2  ;;  %v269_v12 = vpop.f32.mrf.mxu3 }
  0xa0   : > { %v267_v13 = vadd.f32 %v475_v6, %v266_v11  ;;  %v270_v14 = vadd.f32 %v475_v6, %v269_v12 }
  0xa2   : > { %275 = vst.msk [vmem:[%s204_s5 + $0x10] sm:$0xff] %vm272_vm1, %v267_v13 }
  0xa3   : > { %276 = vst.msk [vmem:[%s204_s5 + $0x18] sm:$0xff] %vm272_vm1, %v270_v14 }
  0xa4   : > { %503 = shalt.err (!%p500_p5)
}
  0xa5   : > { %s556_s21 = smov 128   ;;  %s557_s23 = smov 8  }
  0xa6   : > { %418 = dma.vmem_to_hbm [thread:$0]  (%p618_p4), %s293_s6, 512, %s295_s7, %s278_s15, %s556_s21, %s556_s21, %s557_s23  }
  0xa7 PF: > { %p424_p6 = scmp.ge.s32.totalorder %s554_s17, 2  ;;  %s309_s26 = sand.u32 1, %s534_s12  }
  0xa8   : > { %s310_s27 = scalar_lea.sflag [#allocation3], %s309_s26 }
  0xa9   : > { %p421_p7 = pnand %p424_p6, %p625_p8 }
  0xab   : > { %p422_p9 = pneg %p421_p7 }
  0xad   : > { %529 = dma.done.wait (%p422_p9), %s310_s27, 512  }
  0xae   : > { %531 = vsyncadd (%p422_p9), %s310_s27, 4294966784  ;;  %s16_s17 = sadd.s32 1, %s554_s17   ;;  %s700_s12 = smov %s538_s13 }
  0xaf   : > { %p13_p10 = scmp.ge.s32.totalorder %s16_s17, 4   ;;  %s701_s13 = smov %s542_s14 }
  0xb0   : > { %s702_s14 = smov %s631_s25  ;;  %s703_s15 = smov %s550_s16 }
  0xb1   : > { %s704_s16 = smov %s706_s20  ;;  %15 = sbr.rel (!%p13_p10) target bundleno = 4 (0x4), region = 73 }
  0xb6   :  { %316 = vsyncpa [#allocation3], 1 }
  0xb7   :  { %318 = vsyncpa [#allocation3 + $0x1], 1 }

</bundles_post_ra>
